<compile_context>
chip_gen: v7x
topology: tpu7x:2x2x1
jax: 0.10.0
libtpu: 0.0.40
codegen_flags: <defaults>
</compile_context>

<pallas_src>
import functools

import jax
import jax.numpy as jnp
from jax import lax
from jax.experimental import pallas as pl
from jax.experimental.pallas import tpu as pltpu

# ----------------------------- "cfg" constants ------------------------------
NUM_CLASSES = 9
NC = NUM_CLASSES - 1          # 8 class logits
DENSE_POINTS = 1
NUM_TOWER_CONVS = 2           # CLS_NUM_CONVS == BBOX_NUM_CONVS
FPN_STRIDES = (8.0, 16.0)

NCP = NC * DENSE_POINTS       # class-logit rows
NUM_BOX = 4 * DENSE_POINTS
NUM_CTR = 1 * DENSE_POINTS
NUM_HEAD = NUM_BOX + NUM_CTR  # merged bbox_pred + centerness head rows
OUT_ROWS = ((NCP + NUM_HEAD + 7) // 8) * 8   # pad merged output to full f32 sublanes

_TAPS = tuple((dh, dw) for dh in (-1, 0, 1) for dw in (-1, 0, 1))


# ------------------------- pltpu.roll sign probe -----------------------------
@functools.lru_cache(maxsize=None)
def _roll_matches_jnp():
    """True iff pltpu.roll(x, s, axis) follows jnp.roll semantics
    (out[i] = x[(i - s) % n]).  Probed once so the im2col shifts below are
    independent of the rotate sign convention."""
    x = jnp.arange(8 * 128, dtype=jnp.float32).reshape(8, 128)

    def probe(x_ref, o_ref):
        o_ref[...] = pltpu.roll(x_ref[...], 1, 1)

    out = pl.pallas_call(
        probe, out_shape=jax.ShapeDtypeStruct((8, 128), jnp.float32))(x)
    return bool(out[0, 1] == x[0, 0])


# --------------------------------- kernel -----------------------------------
def _fcos_head_kernel(x_ref,
                      wb_ref, bb_ref,
                      w0s_ref, b0s_ref,
                      wct_ref, bct_ref,
                      wbt_ref, bbt_ref,
                      wcls_ref, bcls_ref,
                      whead_ref, bhead_ref,
                      out_ref,
                      patch_ref,
                      *, levels, C, num_tower, roll_like_jnp):
    """levels: static tuple of (lane_offset, H, W, HW, fpn_stride)."""
    hw_total = x_ref.shape[-1]
    bf16 = jnp.bfloat16

    # ---- per-level, per-tap validity masks (lane-only), built once ----------
    # Rolls are applied per level slab so taps can never cross a level
    # boundary; border masks zero out-of-image taps within each level.
    level_masks = []
    for (off, H, W, HW, _s) in levels:
        pos = lax.broadcasted_iota(jnp.int32, (1, HW), 1)
        h_idx = pos // W
        w_idx = pos - h_idx * W
        masks = []
        for dh, dw in _TAPS:
            masks.append((h_idx + dh >= 0) & (h_idx + dh < H) &
                         (w_idx + dw >= 0) & (w_idx + dw < W))
        level_masks.append(masks)

    def im2col(a):
        """(C, HW_total) activation -> fill patch_ref (9C, HW_total) bf16 with
        SAME zero-padded 3x3 patches (one bf16 cast; taps written directly to
        VMEM scratch at static tile-aligned offsets)."""
        a16 = a.astype(bf16)
        for t, (dh, dw) in enumerate(_TAPS):
            for li, (off, H, W, HW, _s) in enumerate(levels):
                a_l = a16[:, off:off + HW]
                o = dh * W + dw
                if o == 0:
                    tap = a_l
                else:
                    # want tap[p] = a[p + o]; shift sign fixed by the probe.
                    sh = (-o) % HW if roll_like_jnp else o % HW
                    tap = jnp.where(level_masks[li][t],
                                    pltpu.roll(a_l, sh, 1), 0.0)
                patch_ref[t * C:(t + 1) * C, off:off + HW] = tap
        return patch_ref[...]

    def mxu(w, p):                                   # bf16 x bf16 -> f32 acc
        return jnp.dot(w, p, preferred_element_type=jnp.float32)

    # ---- base tower: 1x1 conv + ReLU (feature cast to bf16 in-kernel) -------
    x = x_ref[0].astype(bf16)                                     # (C, HW)
    base = jnp.maximum(mxu(wb_ref[...], x) + bb_ref[...], 0.0)    # (C, HW) f32

    # ---- conv-0 of BOTH towers: one stacked (2C, 9C) matmul on shared patch -
    p_base = im2col(base)
    both = jnp.maximum(mxu(w0s_ref[...], p_base) + b0s_ref[...], 0.0)  # (2C,HW)
    ct = both[0:C, :]
    bt = both[C:2 * C, :]

    # ---- remaining cls tower convs + cls_logits ------------------------------
    for i in range(1, num_tower):
        ct = jnp.maximum(mxu(wct_ref[i - 1], im2col(ct)) + bct_ref[i - 1], 0.0)
    logits = mxu(wcls_ref[...], ct.astype(bf16)) + bcls_ref[...]   # (NCP, HW)

    # ---- remaining bbox tower convs ------------------------------------------
    for i in range(1, num_tower):
        bt = jnp.maximum(mxu(wbt_ref[i - 1], im2col(bt)) + bbt_ref[i - 1], 0.0)

    # ---- merged bbox_pred + centerness: one (5, 9C) x (9C, HW) matmul --------
    head = mxu(whead_ref[...], im2col(bt)) + bhead_ref[...]        # (5, HW)

    # per-lane FPN stride (norm_reg_targets=True & eval mode)
    pos_all = lax.broadcasted_iota(jnp.int32, (1, hw_total), 1)
    stride_vec = jnp.zeros((1, hw_total), jnp.float32)
    for (off, H, W, HW, s) in levels:
        in_lvl = (pos_all >= off) & (pos_all < off + HW)
        stride_vec = jnp.where(in_lvl, jnp.float32(s), stride_vec)

    bbox = jnp.maximum(head[0:NUM_BOX, :], 0.0) * stride_vec       # (4, HW)
    ctr = head[NUM_BOX:NUM_HEAD, :]                                # (1, HW)
    pad = jnp.zeros((OUT_ROWS - NCP - NUM_HEAD, hw_total), jnp.float32)

    # single lane-dense, sublane-padded output store (one DMA per grid step)
    slab = jnp.concatenate([logits, bbox, ctr, pad], axis=0)       # (16, HW)
    out_ref[0] = slab.astype(out_ref.dtype)


# -------------------------------- wrapper ------------------------------------
def _const_spec(p):
    zeros = (0,) * p.ndim
    return pl.BlockSpec(p.shape, lambda n, _z=zeros: _z)


def _prepare_kernel_params(params):
    """Repack math-layout params into the (Cout, K) bf16 layout the kernel
    consumes; biases become f32 column vectors (broadcast along lanes).
    cls-tower conv-0 and bbox-tower conv-0 weights are stacked into one slab."""
    C = params["w_base"].shape[0]
    nt = NUM_TOWER_CONVS
    assert nt >= 2, "kernel assumes >= 2 tower convs (cfg default is 2)"
    bf16, f32 = jnp.bfloat16, jnp.float32

    def tower_w(w_flat):       # (nt*9*C, C) -> (nt, C, 9*C), HWIO tap order
        return w_flat.reshape(nt, 9 * C, C).transpose(0, 2, 1)

    wct = tower_w(params["w_cls_tower"])
    wbt = tower_w(params["w_bbox_tower"])
    bct = params["b_cls_tower"]            # (nt, C)
    bbt = params["b_bbox_tower"]

    w0s = jnp.concatenate([wct[0], wbt[0]], axis=0).astype(bf16)          # (2C, 9C)
    b0s = jnp.concatenate([bct[0], bbt[0]]).reshape(-1, 1).astype(f32)    # (2C, 1)

    w_head = jnp.concatenate(
        [params["w_bbox_pred"], params["w_centerness"]], axis=1)          # (9C, 5)
    b_head = jnp.concatenate(
        [params["b_bbox_pred"].reshape(-1), params["b_centerness"].reshape(-1)])

    return [
        params["w_base"].T.astype(bf16),                    # (C, C)
        params["b_base"].reshape(-1, 1).astype(f32),        # (C, 1)
        w0s, b0s,                                           # stacked conv-0
        wct[1:].astype(bf16),                               # (nt-1, C, 9C)
        bct[1:].reshape(nt - 1, C, 1).astype(f32),          # (nt-1, C, 1)
        wbt[1:].astype(bf16),                               # (nt-1, C, 9C)
        bbt[1:].reshape(nt - 1, C, 1).astype(f32),          # (nt-1, C, 1)
        params["w_cls_logits"].T.astype(bf16),              # (NCP, C)
        params["b_cls_logits"].reshape(-1, 1).astype(f32),  # (NCP, 1)
        w_head.T.astype(bf16),                              # (5, 9C)
        b_head.reshape(-1, 1).astype(f32),                  # (5, 1)
    ]


def _cost_estimate(N, C, hw_total, kparams):
    nt = NUM_TOWER_CONVS
    macs = C * C * hw_total                          # base 1x1
    macs += (2 * C) * (9 * C) * hw_total             # stacked conv-0
    macs += 2 * (nt - 1) * C * (9 * C) * hw_total    # remaining tower convs
    macs += NCP * C * hw_total                       # cls_logits 1x1
    macs += NUM_HEAD * (9 * C) * hw_total            # bbox_pred + centerness
    flops = 2 * macs * N
    param_bytes = sum(int(p.size) * p.dtype.itemsize for p in kparams)
    bytes_accessed = (N * C * hw_total * 4            # feature in (f32)
                      + param_bytes                   # weights/biases
                      + N * OUT_ROWS * hw_total * 4)  # merged output slab
    return pl.CostEstimate(flops=flops, transcendentals=0,
                           bytes_accessed=bytes_accessed)


def fcos_head_lite_forward(features_nchw, params):
    """features_nchw: list of (N, C, H, W) arrays (one per FPN level).
    Returns (logits, bbox_reg, centerness) lists in NCHW layout, matching the
    PyTorch module (eval mode)."""
    kparams = _prepare_kernel_params(params)
    roll_like_jnp = _roll_matches_jnp()

    N, C = features_nchw[0].shape[0], features_nchw[0].shape[1]
    levels, xs = [], []
    off = 0
    for l, feat in enumerate(features_nchw):
        n, c, H, W = feat.shape
        HW = H * W
        levels.append((off, H, W, HW, float(FPN_STRIDES[l])))
        xs.append(feat.reshape(n, c, HW))     # NCHW -> (N, C, HW): pure reshape
        off += HW
    hw_total = off
    # merge levels along the lane axis; stays f32 (cast to bf16 in-kernel)
    x = jnp.concatenate(xs, axis=2) if len(xs) > 1 else xs[0]   # (N, C, HWtot)

    kern = functools.partial(
        _fcos_head_kernel, levels=tuple(levels), C=C,
        num_tower=NUM_TOWER_CONVS, roll_like_jnp=roll_like_jnp)

    in_specs = [pl.BlockSpec((1, C, hw_total), lambda n: (n, 0, 0))]
    in_specs += [_const_spec(p) for p in kparams]

    out = pl.pallas_call(
        kern,
        grid=(N,),
        in_specs=in_specs,
        out_specs=pl.BlockSpec((1, OUT_ROWS, hw_total), lambda n: (n, 0, 0)),
        out_shape=jax.ShapeDtypeStruct((N, OUT_ROWS, hw_total), jnp.float32),
        scratch_shapes=[pltpu.VMEM((9 * C, hw_total), jnp.bfloat16)],
        compiler_params=pltpu.CompilerParams(
            dimension_semantics=("parallel",)),      # v7x: 2 TCs over images
        cost_estimate=_cost_estimate(N, C, hw_total, kparams),
    )(x, *kparams)

    # split the merged slab back into per-level NCHW outputs (pure slicing)
    logits_all, breg_all, ctr_all = [], [], []
    for (off, H, W, HW, _s) in levels:
        sl = out[:, :, off:off + HW]
        logits_all.append(sl[:, 0:NCP].reshape(N, NCP, H, W))
        breg_all.append(sl[:, NCP:NCP + NUM_BOX].reshape(N, NUM_BOX, H, W))
        ctr_all.append(
            sl[:, NCP + NUM_BOX:NCP + NUM_HEAD].reshape(N, NUM_CTR, H, W))
    return logits_all, breg_all, ctr_all


# --------------------------- deterministic params ----------------------------
def init_params(key, C):
    keys = jax.random.split(key, 12)

    def mk(k, shape, scale=0.05):
        return (scale * jax.random.normal(k, shape)).astype(jnp.float32)

    return {
        "w_base": mk(keys[0], (C, C)),
        "b_base": mk(keys[1], (1, C), 0.01),
        # 3x3 tower weights stacked as (num_convs * 9 * C, C), HWIO tap order
        "w_cls_tower": mk(keys[2], (NUM_TOWER_CONVS * 9 * C, C)),
        "b_cls_tower": mk(keys[3], (NUM_TOWER_CONVS, C), 0.01),
        "w_bbox_tower": mk(keys[4], (NUM_TOWER_CONVS * 9 * C, C)),
        "b_bbox_tower": mk(keys[5], (NUM_TOWER_CONVS, C), 0.01),
        "w_cls_logits": mk(keys[6], (C, NCP)),
        "b_cls_logits": mk(keys[7], (1, NCP), 0.01),
        "w_bbox_pred": mk(keys[8], (9 * C, 4 * DENSE_POINTS)),
        "b_bbox_pred": mk(keys[9], (1, 4 * DENSE_POINTS), 0.01),
        "w_centerness": mk(keys[10], (9 * C, 1 * DENSE_POINTS)),
        "b_centerness": mk(keys[11], (1, 1 * DENSE_POINTS), 0.01),
    }


# ------------------------------ pure-JAX reference ---------------------------
def _conv_ref(x_nhwc, w_flat, b, k=3):
    c_in = x_nhwc.shape[-1]
    c_out = w_flat.shape[-1]
    w = w_flat.reshape(k, k, c_in, c_out)
    y = lax.conv_general_dilated(
        x_nhwc, w, (1, 1), "SAME",
        dimension_numbers=("NHWC", "HWIO", "NHWC"),
        precision=lax.Precision.HIGHEST)
    return y + b.reshape(1, 1, 1, c_out)


def ref_forward(features_nchw, p):
    logits_all, breg_all, ctr_all = [], [], []
    for l, feat in enumerate(features_nchw):
        x = jnp.transpose(feat, (0, 2, 3, 1))
        C = x.shape[-1]
        base = jax.nn.relu(
            jnp.einsum("nhwc,cd->nhwd", x, p["w_base"],
                       precision=lax.Precision.HIGHEST)
            + p["b_base"].reshape(1, 1, 1, -1))
        ct = base
        wct = p["w_cls_tower"].reshape(NUM_TOWER_CONVS, 9 * C, C)
        for i in range(NUM_TOWER_CONVS):
            ct = jax.nn.relu(_conv_ref(ct, wct[i], p["b_cls_tower"][i]))
        bt = base
        wbt = p["w_bbox_tower"].reshape(NUM_TOWER_CONVS, 9 * C, C)
        for i in range(NUM_TOWER_CONVS):
            bt = jax.nn.relu(_conv_ref(bt, wbt[i], p["b_bbox_tower"][i]))
        logits = (jnp.einsum("nhwc,cd->nhwd", ct, p["w_cls_logits"],
                             precision=lax.Precision.HIGHEST)
                  + p["b_cls_logits"].reshape(1, 1, 1, -1))
        ctr = _conv_ref(bt, p["w_centerness"], p["b_centerness"])
        bp = jax.nn.relu(_conv_ref(bt, p["w_bbox_pred"], p["b_bbox_pred"])) \
             * FPN_STRIDES[l]
        to_nchw = lambda a: jnp.transpose(a, (0, 3, 1, 2))
        logits_all.append(to_nchw(logits))
        breg_all.append(to_nchw(bp))
        ctr_all.append(to_nchw(ctr))
    return logits_all, breg_all, ctr_all


# ----------------------------------- main ------------------------------------
if __name__ == "__main__":
    key = jax.random.PRNGKey(0)
    k_feat0, k_feat1, k_params = jax.random.split(key, 3)

    N, C = 2, 32
    # Two FPN levels; H*W per level is a multiple of 128 so the merged lane
    # axis (512 + 128 = 640) keeps every slice and store lane-aligned.
    feats = [
        jax.random.normal(k_feat0, (N, C, 32, 16), dtype=jnp.float32),
        jax.random.normal(k_feat1, (N, C, 16, 8), dtype=jnp.float32),
    ]
    params = init_params(k_params, C)

    _roll_matches_jnp()   # run the roll-sign probe once, outside the jitted trace

    fwd = jax.jit(fcos_head_lite_forward)
    logits, bbox_reg, centerness = fwd(feats, params)
    jax.block_until_ready(logits + bbox_reg + centerness)

    # sanity check against a plain-JAX f32 reference (kernel matmuls are bf16;
    # loosened tolerance is intentional for a detection head)
    r_logits, r_bbox, r_ctr = ref_forward(feats, params)
    for got, ref in zip(logits + bbox_reg + centerness,
                        r_logits + r_bbox + r_ctr):
        assert got.shape == ref.shape, (got.shape, ref.shape)
        err = float(jnp.max(jnp.abs(got - ref)))
        assert jnp.allclose(got, ref, rtol=5e-2, atol=1e-1), err

    print("KERNEL_OK")
</pallas_src>

<mosaic_0001>
module attributes {stable_mosaic.version = 11 : i64} {
  func.func @probe(%arg0: memref<8x128xf32, #tpu.memory_space<vmem>>, %arg1: memref<8x128xf32, #tpu.memory_space<vmem>>) attributes {dimension_semantics = [], scalar_prefetch = 0 : i64, scratch_operands = 0 : i64, tpu.core_type = #tpu.core_type<tc>} {
    %c0 = arith.constant 0 : index
    %c0_0 = arith.constant 0 : index
    %0 = vector.load %arg0[%c0, %c0_0] : memref<8x128xf32, #tpu.memory_space<vmem>>, vector<8x128xf32>
    %c1_i32 = arith.constant 1 : i32
    %1 = tpu.dynamic_rotate %0 by %c1_i32 dim 1 : vector<8x128xf32>, i32 -> vector<8x128xf32>
    %c0_1 = arith.constant 0 : index
    %c0_2 = arith.constant 0 : index
    %2 = vector.load %arg1[%c0_1, %c0_2] : memref<8x128xf32, #tpu.memory_space<vmem>>, vector<8x128xf32>
    tpu.vector_store %arg1[%c0_1, %c0_2], %1 {strides = array<i32>} : memref<8x128xf32, #tpu.memory_space<vmem>>, vector<8x128xf32>,
    return
  }
}

</mosaic_0001>

<bundles_post_ra>
// kernel: tpu_custom_call.1
= control target key start
LH: loop header
LB: loop body
LE: loop exit
PB: predicated region body
PF: predicated region fallthrough
CT: control target
= control target key end

     0   :  { %6 = vsyncpa [#allocation3], 0  ;;  %s128_s0 = inlined_call_operand.hbm [shape: f32[8,128], index: 0, kind: input, shape index: {}]   ;;  %s129_s1 = inlined_call_operand.hbm [shape: f32[8,128], index: 1, kind: output, shape index: {}]  }
   0x1   :  { %7 = vsyncpa [#allocation4], 0  ;;  %s91_s6 = smov [#allocation2]   ;;  %s43_s10 = scalar_lea.hbm %s128_s0, 128 }
   0x2   :  { %s14_s7 = sshll.u32 %s91_s6, 4  ;;  %p44_p0 = scmp.ne.s32.totalorder %s128_s0, %s43_s10  ;;  %s15_s7 = int_to_ptr.vmem [resolvable:$true] %s14_s7 }
   0x3   :  { %p47_p1 = scmp.lt.u32.totalorder %s43_s10, %s128_s0 }
   0x5   :  { %p49_p2 = pnand %p47_p1, %p44_p0 }
   0x7   :  { %52 = shalt.err (!%p49_p2)
}
   0x8   :  { %s53_s15 = scalar_lea.vmem %s15_s7, 128  ;;  %p58_p4 = scmp.lt.s32.totalorder %s15_s7, %s15_s7 }
   0x9   :  { %p54_p3 = scmp.ne.s32.totalorder %s15_s7, %s53_s15  ;;  %p59_p5 = scmp.lt.s32.totalorder %s53_s15, %s53_s15 }
   0xb   :  { %p60_p6 = por %p59_p5, %p58_p4 }
   0xd   :  { %p61_p7 = pnand %p60_p6, %p54_p3 }
   0xf   :  { %64 = shalt.err (!%p61_p7)
}
  0x10   :  { %17 = dma.hbm_to_vmem [thread:$0]  %s128_s0, 128, %s15_s7, [#allocation3]  }
  0x11   :  { %87 = dma.done.wait [#allocation3], 128  }
  0x12   :  { %88 = vsyncadd [#allocation3], 4294967168  ;;  %v21_v0 = vld [vmem:[#allocation2] sm:$0xff]  ;;  %s92_s18 = smov 1   ;;  %s93_s19 = smov [#allocation5]  }
  0x13   :  { %22 = vrot.lane.b32.xlu0 %v21_v0, %s92_s18  ;;  %s31_s20 = sshll.u32 %s93_s19, 4  ;;  %s32_s20 = int_to_ptr.vmem [resolvable:$true] %s31_s20 }
  0x14   :  { %s65_s21 = scalar_lea.vmem %s32_s20, 128  ;;  %p70_p9 = scmp.lt.s32.totalorder %s32_s20, %s32_s20 }
  0x15   :  { %p66_p8 = scmp.ne.s32.totalorder %s32_s20, %s65_s21  ;;  %p71_p10 = scmp.lt.s32.totalorder %s65_s21, %s65_s21 }
  0x17   :  { %p72_p11 = por %p71_p10, %p70_p9 }
  0x19   :  { %p73_p12 = pnand %p72_p11, %p66_p8 }
  0x85   :  { %v23_v1 = vpop.permute.xlu0 %22 }
  0x86   :  { %24 = vst [vmem:[#allocation5] sm:$0xff] %v23_v1 }
  0x87   :  { %76 = shalt.err (!%p73_p12)
}
  0x88   :  { %s77_s0 = scalar_lea.hbm %s129_s1, 128 }
  0x89   :  { %p78_p13 = scmp.ne.s32.totalorder %s129_s1, %s77_s0  ;;  %p81_p0 = scmp.lt.u32.totalorder %s77_s0, %s129_s1 }
  0x8b   :  { %p83_p1 = pnand %p81_p0, %p78_p13 }
  0x8d   :  { %86 = shalt.err (!%p83_p1)
}
  0x8e   :  { %34 = dma.vmem_to_hbm [thread:$0]  %s32_s20, 128, %s129_s1, [#allocation4]  }
  0x8f   :  { %89 = dma.done.wait [#allocation4], 128  }
  0x90   :  { %90 = vsyncadd [#allocation4], 4294967168 }
  0x91   :  { %38 = vsyncpa [#allocation3], 1 }
  0x92   :  { %39 = vsyncpa [#allocation4], 1 }

</bundles_post_ra>
